<compile_context>
chip_gen: v7x
topology: tpu7x:2x2x1
jax: 0.10.0
libtpu: 0.0.40
codegen_flags: <defaults>
</compile_context>

<pallas_src>
import math
import functools

import jax
import jax.numpy as jnp
from jax import lax
from jax.experimental import pallas as pl
from jax.experimental.pallas import tpu as pltpu


def _attn_kernel(x_ref, mask_ref, wq_ref, bq_ref, wk_ref, bk_ref, wv_ref, bv_ref,
                 o_ref, k_sc, v_sc, *, num_heads, qk_head_size, head_size, scale):
    # x_ref:    (1, S, hidden)                   full sequence (revisited across t)
    # mask_ref: (1, 1, 1, S)                     additive attention mask (f32)
    # wq_ref:   (hidden, dq_all) bf16            bq_ref: (1, dq_all) f32
    # wk_ref:   (hidden, dq_all) bf16            bk_ref: (1, dq_all) f32
    # wv_ref:   (hidden, dv_all) bf16            bv_ref: (1, dv_all) f32
    # o_ref:    (1, tq, dv_all)                  lane-dense output tile
    # k_sc:     (S, dq_all) bf16 VMEM scratch    v_sc: (S, dv_all) bf16 VMEM scratch
    t = pl.program_id(1)
    S = x_ref.shape[1]
    tq = o_ref.shape[1]

    # K / V projections for the FULL sequence, once per batch element (t == 0),
    # cached in bf16 VMEM scratch that persists across the query-tile axis.
    @pl.when(t == 0)
    def _():
        x_all = x_ref[0].astype(jnp.bfloat16)                           # (S, hidden)
        k_sc[...] = (jnp.dot(x_all, wk_ref[...],
                             preferred_element_type=jnp.float32)
                     + bk_ref[...]).astype(jnp.bfloat16)
        v_sc[...] = (jnp.dot(x_all, wv_ref[...],
                             preferred_element_type=jnp.float32)
                     + bv_ref[...]).astype(jnp.bfloat16)

    # Q projection for this query tile only (bf16 MXU operands, f32 accumulate);
    # 1/sqrt(head_size) folded into q (tq*dq multiplies instead of tq*S).
    q_start = pl.multiple_of(t * tq, tq)
    xq = x_ref[0, pl.ds(q_start, tq), :].astype(jnp.bfloat16)           # (tq, hidden)
    q = ((jnp.dot(xq, wq_ref[...], preferred_element_type=jnp.float32)
          + bq_ref[...]) * scale).astype(jnp.bfloat16)                  # (tq, dq_all)

    k = k_sc[...]                                                       # (S, dq_all)
    v = v_sc[...]                                                       # (S, dv_all)

    # Additive mask broadcast hoisted out of the unrolled head loop
    # (JAX does not CSE broadcast_in_dim).
    mask_b = jnp.broadcast_to(mask_ref[0, 0], (tq, S))                  # f32

    # Heads processed in pairs so each context store is a 128-lane slab for the
    # real BERT head_size=64 (single unmasked vst instead of two masked ones).
    pair = 2 if num_heads % 2 == 0 else 1
    for h0 in range(0, num_heads, pair):
        ctx_parts = []
        for h in range(h0, h0 + pair):
            qh = q[:, h * qk_head_size:(h + 1) * qk_head_size]          # (tq, dq)
            kh = k[:, h * qk_head_size:(h + 1) * qk_head_size]          # (S, dq)
            vh = v[:, h * head_size:(h + 1) * head_size]                # (S, dv)

            # q @ k^T without materializing the transpose (MXU transposed-RHS path).
            scores = lax.dot_general(
                qh, kh,
                dimension_numbers=(((1,), (1,)), ((), ())),
                preferred_element_type=jnp.float32)                     # (tq, S)
            scores = scores + mask_b

            # Softmax kept in f32 (v5e has no bf16 VPU/EUP); exact over the full
            # key range since K/V are full-length every grid step.
            m = jnp.max(scores, axis=-1, keepdims=True)
            e = jnp.exp(scores - m)
            denom = jnp.sum(e, axis=-1, keepdims=True)
            probs = (e * pl.reciprocal(denom, approx=True)).astype(jnp.bfloat16)

            ctx_parts.append(
                jnp.dot(probs, vh, preferred_element_type=jnp.float32))  # (tq, dv)

        slab = ctx_parts[0] if pair == 1 else jnp.concatenate(ctx_parts, axis=-1)
        o_ref[0, :, h0 * head_size:(h0 + pair) * head_size] = slab.astype(o_ref.dtype)


def _pick_q_tile(S):
    """Largest query tile that divides S; full S for short sequences."""
    if S <= 512:
        return S
    for tq in (512, 256, 128, 64):
        if S % tq == 0:
            return tq
    return S


def _default_vmem_limit_bytes():
    # Chip-aware scoped-VMEM limit: ~75% of physical VMEM
    # (v7x 64 MiB -> 48 MiB; v5e/v6e 128 MiB -> 96 MiB), leaving headroom.
    cap = 128 * 1024 * 1024
    try:
        cap = int(pltpu.get_tpu_info().vmem_capacity_bytes)
    except Exception:
        pass
    return min((cap * 3) // 4, 100 * 1024 * 1024)


def bert_self_attention(hidden_states, attention_mask, params, *,
                        num_heads, head_size, qk_head_size, q_tile=None):
    """hidden_states: (B, S, hidden); attention_mask: (B, 1, 1, S) additive."""
    B, S, hidden = hidden_states.shape
    dq_all = num_heads * qk_head_size       # all_head_size (== config.key_size)
    dv_all = num_heads * head_size          # num_heads * attention_head_size
    scale = 1.0 / math.sqrt(head_size)      # module divides by sqrt(attention_head_size)

    tq = q_tile if q_tile is not None else _pick_q_tile(S)
    assert S % tq == 0, "query tile must divide the sequence length"
    n_qt = S // tq

    # PyTorch Linear: y = x @ W.T + b with W of shape (out, in).  Transpose once
    # host-side and cast to bf16 so the VMEM-resident weights (constant
    # index_map) are half-width bf16 MXU operands.  Biases stay f32.
    wq_t = params["wq"].T.astype(jnp.bfloat16)            # (hidden, dq_all)
    wk_t = params["wk"].T.astype(jnp.bfloat16)            # (hidden, dq_all)
    wv_t = params["wv"].T.astype(jnp.bfloat16)            # (hidden, dv_all)
    bq = params["bq"].reshape(1, dq_all).astype(jnp.float32)
    bk = params["bk"].reshape(1, dq_all).astype(jnp.float32)
    bv = params["bv"].reshape(1, dv_all).astype(jnp.float32)

    kernel = functools.partial(
        _attn_kernel,
        num_heads=num_heads,
        qk_head_size=qk_head_size,
        head_size=head_size,
        scale=scale,
    )

    out = pl.pallas_call(
        kernel,
        out_shape=jax.ShapeDtypeStruct((B, S, dv_all), hidden_states.dtype),
        grid_spec=pltpu.PrefetchScalarGridSpec(
            num_scalar_prefetch=0,
            grid=(B, n_qt),
            in_specs=[
                pl.BlockSpec((1, S, hidden), lambda b, t: (b, 0, 0)),       # x (full seq)
                pl.BlockSpec((1, 1, 1, S), lambda b, t: (b, 0, 0, 0)),      # mask
                pl.BlockSpec((hidden, dq_all), lambda b, t: (0, 0)),        # wq (resident)
                pl.BlockSpec((1, dq_all), lambda b, t: (0, 0)),             # bq
                pl.BlockSpec((hidden, dq_all), lambda b, t: (0, 0)),        # wk
                pl.BlockSpec((1, dq_all), lambda b, t: (0, 0)),             # bk
                pl.BlockSpec((hidden, dv_all), lambda b, t: (0, 0)),        # wv
                pl.BlockSpec((1, dv_all), lambda b, t: (0, 0)),             # bv
            ],
            out_specs=pl.BlockSpec((1, tq, dv_all), lambda b, t: (b, t, 0)),  # lane-dense
            scratch_shapes=[
                pltpu.VMEM((S, dq_all), jnp.bfloat16),    # K cache (per batch elem)
                pltpu.VMEM((S, dv_all), jnp.bfloat16),    # V cache (per batch elem)
            ],
        ),
        compiler_params=pltpu.CompilerParams(
            # batch axis sharded across TCs; query-tile axis must stay sequential
            # because K/V scratch is filled at t == 0 and reused for t > 0.
            dimension_semantics=("parallel", "arbitrary"),
            vmem_limit_bytes=_default_vmem_limit_bytes(),
        ),
    )(hidden_states, attention_mask, wq_t, bq, wk_t, bk, wv_t, bv)

    return out  # already (B, S, num_heads * head_size)


def reference(hidden_states, attention_mask, params, *,
              num_heads, head_size, qk_head_size):
    B, S, hidden = hidden_states.shape
    q = hidden_states @ params["wq"].T + params["bq"]
    k = hidden_states @ params["wk"].T + params["bk"]
    v = hidden_states @ params["wv"].T + params["bv"]
    q = q.reshape(B, S, num_heads, qk_head_size).transpose(0, 2, 1, 3)
    k = k.reshape(B, S, num_heads, qk_head_size).transpose(0, 2, 1, 3)
    v = v.reshape(B, S, num_heads, head_size).transpose(0, 2, 1, 3)
    scores = jnp.einsum("bhqd,bhkd->bhqk", q, k) / math.sqrt(head_size)
    scores = scores + attention_mask
    probs = jax.nn.softmax(scores, axis=-1)
    ctx = jnp.einsum("bhqk,bhkd->bhqd", probs, v)
    return ctx.transpose(0, 2, 1, 3).reshape(B, S, num_heads * head_size)


if __name__ == "__main__":
    # Small config consistent with the module's __init__:
    #   hidden_size=32, num_attention_heads=4 -> attention_head_size=8
    #   key_size=16 -> all_head_size=16, per-head Q/K dim = 4
    B, S, hidden = 2, 8, 32
    num_heads, head_size = 4, 8
    key_size = 16
    qk_head_size = key_size // num_heads

    key = jax.random.PRNGKey(0)
    k_x, k_wq, k_bq, k_wk, k_bk, k_wv, k_bv, k_m = jax.random.split(key, 8)

    hidden_states = jax.random.normal(k_x, (B, S, hidden), dtype=jnp.float32)
    # Additive attention mask (0 keep, -1e9 masked); mask last 2 keys of batch 1.
    mask = jnp.zeros((B, 1, 1, S), dtype=jnp.float32)
    mask = mask.at[1, 0, 0, -2:].set(-1e9)

    params = {
        "wq": 0.1 * jax.random.normal(k_wq, (key_size, hidden), dtype=jnp.float32),
        "bq": 0.1 * jax.random.normal(k_bq, (key_size,), dtype=jnp.float32),
        "wk": 0.1 * jax.random.normal(k_wk, (key_size, hidden), dtype=jnp.float32),
        "bk": 0.1 * jax.random.normal(k_bk, (key_size,), dtype=jnp.float32),
        "wv": 0.1 * jax.random.normal(k_wv, (num_heads * head_size, hidden),
                                      dtype=jnp.float32),
        "bv": 0.1 * jax.random.normal(k_bv, (num_heads * head_size,),
                                      dtype=jnp.float32),
    }

    out = bert_self_attention(hidden_states, mask, params,
                              num_heads=num_heads, head_size=head_size,
                              qk_head_size=qk_head_size)
    out = jax.block_until_ready(out)

    ref = reference(hidden_states, mask, params,
                    num_heads=num_heads, head_size=head_size,
                    qk_head_size=qk_head_size)

    assert out.shape == (B, S, num_heads * head_size)
    # Tolerance accounts for bf16 MXU operands (f32 accumulation) and the
    # approximate (EUP) softmax reciprocal; reference is pure f32.
    assert jnp.allclose(out, ref, atol=3e-2, rtol=3e-2), "mismatch vs reference"
    print("KERNEL_OK")
</pallas_src>

<mosaic_0001>
module attributes {stable_mosaic.version = 11 : i64} {
  func.func @_attn_kernel(%arg0: i32, %arg1: i32, %arg2: memref<1x8x32xf32, #tpu.memory_space<vmem>>, %arg3: memref<1x1x1x8xf32, #tpu.memory_space<vmem>>, %arg4: memref<32x16xbf16, #tpu.memory_space<vmem>>, %arg5: memref<1x16xf32, #tpu.memory_space<vmem>>, %arg6: memref<32x16xbf16, #tpu.memory_space<vmem>>, %arg7: memref<1x16xf32, #tpu.memory_space<vmem>>, %arg8: memref<32x32xbf16, #tpu.memory_space<vmem>>, %arg9: memref<1x32xf32, #tpu.memory_space<vmem>>, %arg10: memref<1x8x32xf32, #tpu.memory_space<vmem>>, %arg11: memref<8x16xbf16, #tpu.memory_space<vmem>>, %arg12: memref<8x32xbf16, #tpu.memory_space<vmem>>) attributes {dimension_semantics = [#tpu.dimension_semantics<parallel>, #tpu.dimension_semantics<arbitrary>], iteration_bounds = array<i64: 2, 1>, scalar_prefetch = 0 : i64, scratch_operands = 2 : i64, tpu.core_type = #tpu.core_type<tc>, window_params = [{transform_indices = @transform_0, window_bounds = array<i64: 1, 8, 32>}, {transform_indices = @transform_1, window_bounds = array<i64: 1, 1, 1, 8>}, {pipeline_mode = #tpu.pipeline_mode<synchronous>, transform_indices = @transform_2, window_bounds = array<i64: 32, 16>}, {pipeline_mode = #tpu.pipeline_mode<synchronous>, transform_indices = @transform_3, window_bounds = array<i64: 1, 16>}, {pipeline_mode = #tpu.pipeline_mode<synchronous>, transform_indices = @transform_4, window_bounds = array<i64: 32, 16>}, {pipeline_mode = #tpu.pipeline_mode<synchronous>, transform_indices = @transform_5, window_bounds = array<i64: 1, 16>}, {pipeline_mode = #tpu.pipeline_mode<synchronous>, transform_indices = @transform_6, window_bounds = array<i64: 32, 32>}, {pipeline_mode = #tpu.pipeline_mode<synchronous>, transform_indices = @transform_7, window_bounds = array<i64: 1, 32>}, {transform_indices = @transform_8, window_bounds = array<i64: 1, 8, 32>}]} {
    %c0_i32 = arith.constant 0 : i32
    %0 = arith.cmpi eq, %arg1, %c0_i32 : i32
    %1 = arith.extui %0 : i1 to i32
    %c0_i32_0 = arith.constant 0 : i32
    %2 = arith.cmpi ne, %1, %c0_i32_0 : i32
    scf.if %2 {
      %c0_36 = arith.constant 0 : index
      %c0_37 = arith.constant 0 : index
      %c0_38 = arith.constant 0 : index
      %99 = vector.load %arg2[%c0_36, %c0_37, %c0_38] : memref<1x8x32xf32, #tpu.memory_space<vmem>>, vector<1x8x32xf32>
      %100 = vector.shape_cast %99 : vector<1x8x32xf32> to vector<8x32xf32>
      %101 = arith.truncf %100 : vector<8x32xf32> to vector<8x32xbf16>
      %c0_39 = arith.constant 0 : index
      %c0_40 = arith.constant 0 : index
      %102 = vector.load %arg6[%c0_39, %c0_40] : memref<32x16xbf16, #tpu.memory_space<vmem>>, vector<32x16xbf16>
      %cst_41 = arith.constant dense<0.000000e+00> : vector<8x16xf32>
      %103 = tpu.matmul %101, %102, %cst_41 {dimension_numbers = #tpu.dot_dimension_numbers<[1], [0], [0], [1], [0, 0, 1, 1], [], []>} : vector<8x32xbf16>, vector<32x16xbf16>, vector<8x16xf32> -> vector<8x16xf32>
      %c0_42 = arith.constant 0 : index
      %c0_43 = arith.constant 0 : index
      %104 = vector.load %arg7[%c0_42, %c0_43] : memref<1x16xf32, #tpu.memory_space<vmem>>, vector<1x16xf32>
      %105 = vector.broadcast %104 : vector<1x16xf32> to vector<8x16xf32>
      %106 = arith.addf %103, %105 : vector<8x16xf32>
      %107 = arith.truncf %106 : vector<8x16xf32> to vector<8x16xbf16>
      %c0_44 = arith.constant 0 : index
      %c0_45 = arith.constant 0 : index
      %108 = vector.load %arg11[%c0_44, %c0_45] : memref<8x16xbf16, #tpu.memory_space<vmem>>, vector<8x16xbf16>
      tpu.vector_store %arg11[%c0_44, %c0_45], %107 {strides = array<i32>} : memref<8x16xbf16, #tpu.memory_space<vmem>>, vector<8x16xbf16>,
      %c0_46 = arith.constant 0 : index
      %c0_47 = arith.constant 0 : index
      %109 = vector.load %arg8[%c0_46, %c0_47] : memref<32x32xbf16, #tpu.memory_space<vmem>>, vector<32x32xbf16>
      %cst_48 = arith.constant dense<0.000000e+00> : vector<8x32xf32>
      %110 = tpu.matmul %101, %109, %cst_48 {dimension_numbers = #tpu.dot_dimension_numbers<[1], [0], [0], [1], [0, 0, 1, 1], [], []>} : vector<8x32xbf16>, vector<32x32xbf16>, vector<8x32xf32> -> vector<8x32xf32>
      %c0_49 = arith.constant 0 : index
      %c0_50 = arith.constant 0 : index
      %111 = vector.load %arg9[%c0_49, %c0_50] : memref<1x32xf32, #tpu.memory_space<vmem>>, vector<1x32xf32>
      %112 = vector.broadcast %111 : vector<1x32xf32> to vector<8x32xf32>
      %113 = arith.addf %110, %112 : vector<8x32xf32>
      %114 = arith.truncf %113 : vector<8x32xf32> to vector<8x32xbf16>
      %c0_51 = arith.constant 0 : index
      %c0_52 = arith.constant 0 : index
      %115 = vector.load %arg12[%c0_51, %c0_52] : memref<8x32xbf16, #tpu.memory_space<vmem>>, vector<8x32xbf16>
      tpu.vector_store %arg12[%c0_51, %c0_52], %114 {strides = array<i32>} : memref<8x32xbf16, #tpu.memory_space<vmem>>, vector<8x32xbf16>,
    } else {
    }
    %c8_i32 = arith.constant 8 : i32
    %3 = arith.muli %arg1, %c8_i32 : i32
    %4 = tpu.assume_multiple %3, 8 : i32
    %c0 = arith.constant 0 : index
    %5 = arith.index_cast %4 : i32 to index
    %c0_1 = arith.constant 0 : index
    %6 = vector.load %arg2[%c0, %5, %c0_1] : memref<1x8x32xf32, #tpu.memory_space<vmem>>, vector<1x8x32xf32>
    %7 = vector.shape_cast %6 : vector<1x8x32xf32> to vector<8x32xf32>
    %8 = arith.truncf %7 : vector<8x32xf32> to vector<8x32xbf16>
    %c0_2 = arith.constant 0 : index
    %c0_3 = arith.constant 0 : index
    %9 = vector.load %arg4[%c0_2, %c0_3] : memref<32x16xbf16, #tpu.memory_space<vmem>>, vector<32x16xbf16>
    %cst = arith.constant dense<0.000000e+00> : vector<8x16xf32>
    %10 = tpu.matmul %8, %9, %cst {dimension_numbers = #tpu.dot_dimension_numbers<[1], [0], [0], [1], [0, 0, 1, 1], [], []>} : vector<8x32xbf16>, vector<32x16xbf16>, vector<8x16xf32> -> vector<8x16xf32>
    %c0_4 = arith.constant 0 : index
    %c0_5 = arith.constant 0 : index
    %11 = vector.load %arg5[%c0_4, %c0_5] : memref<1x16xf32, #tpu.memory_space<vmem>>, vector<1x16xf32>
    %12 = vector.broadcast %11 : vector<1x16xf32> to vector<8x16xf32>
    %13 = arith.addf %10, %12 : vector<8x16xf32>
    %cst_6 = arith.constant 0.353553385 : f32
    %14 = vector.broadcast %cst_6 : f32 to vector<8x16xf32>
    %15 = arith.mulf %13, %14 : vector<8x16xf32>
    %16 = arith.truncf %15 : vector<8x16xf32> to vector<8x16xbf16>
    %c0_7 = arith.constant 0 : index
    %c0_8 = arith.constant 0 : index
    %17 = vector.load %arg11[%c0_7, %c0_8] : memref<8x16xbf16, #tpu.memory_space<vmem>>, vector<8x16xbf16>
    %c0_9 = arith.constant 0 : index
    %c0_10 = arith.constant 0 : index
    %18 = vector.load %arg12[%c0_9, %c0_10] : memref<8x32xbf16, #tpu.memory_space<vmem>>, vector<8x32xbf16>
    %c0_11 = arith.constant 0 : index
    %c0_12 = arith.constant 0 : index
    %c0_13 = arith.constant 0 : index
    %c0_14 = arith.constant 0 : index
    %19 = vector.load %arg3[%c0_11, %c0_12, %c0_13, %c0_14] : memref<1x1x1x8xf32, #tpu.memory_space<vmem>>, vector<1x1x1x8xf32>
    %20 = vector.shape_cast %19 : vector<1x1x1x8xf32> to vector<1x8xf32>
    %21 = vector.shape_cast %20 : vector<1x8xf32> to vector<1x8xf32>
    %22 = vector.broadcast %21 : vector<1x8xf32> to vector<8x8xf32>
    %23 = vector.extract_strided_slice %16 {offsets = [0, 0], sizes = [8, 4], strides = [1, 1]} : vector<8x16xbf16> to vector<8x4xbf16>
    %24 = vector.extract_strided_slice %17 {offsets = [0, 0], sizes = [8, 4], strides = [1, 1]} : vector<8x16xbf16> to vector<8x4xbf16>
    %25 = vector.extract_strided_slice %18 {offsets = [0, 0], sizes = [8, 8], strides = [1, 1]} : vector<8x32xbf16> to vector<8x8xbf16>
    %cst_15 = arith.constant dense<0.000000e+00> : vector<8x8xf32>
    %26 = tpu.matmul %23, %24, %cst_15 {dimension_numbers = #tpu.dot_dimension_numbers<[1], [1], [0], [0], [0, 0, 1, 0], [], []>} : vector<8x4xbf16>, vector<8x4xbf16>, vector<8x8xf32> -> vector<8x8xf32>
    %27 = arith.addf %26, %22 : vector<8x8xf32>
    %cst_16 = arith.constant dense<0xFF800000> : vector<8xf32>
    %28 = vector.multi_reduction <maximumf>, %27, %cst_16 [1] : vector<8x8xf32> to vector<8xf32>
    %29 = vector.shape_cast %28 : vector<8xf32> to vector<8x1xf32>
    %30 = vector.broadcast %29 : vector<8x1xf32> to vector<8x8xf32>
    %31 = arith.subf %27, %30 : vector<8x8xf32>
    %32 = math.exp %31 : vector<8x8xf32>
    %cst_17 = arith.constant dense<0.000000e+00> : vector<8xf32>
    %33 = vector.multi_reduction <add>, %32, %cst_17 [1] : vector<8x8xf32> to vector<8xf32>
    %34 = vector.shape_cast %33 : vector<8xf32> to vector<8x1xf32>
    %35 = tpu.reciprocal %34 {approx = true} : vector<8x1xf32> -> vector<8x1xf32>
    %36 = vector.broadcast %35 : vector<8x1xf32> to vector<8x8xf32>
    %37 = arith.mulf %32, %36 : vector<8x8xf32>
    %38 = arith.truncf %37 : vector<8x8xf32> to vector<8x8xbf16>
    %cst_18 = arith.constant dense<0.000000e+00> : vector<8x8xf32>
    %39 = tpu.matmul %38, %25, %cst_18 {dimension_numbers = #tpu.dot_dimension_numbers<[1], [0], [0], [1], [0, 0, 1, 1], [], []>} : vector<8x8xbf16>, vector<8x8xbf16>, vector<8x8xf32> -> vector<8x8xf32>
    %40 = vector.extract_strided_slice %16 {offsets = [0, 4], sizes = [8, 4], strides = [1, 1]} : vector<8x16xbf16> to vector<8x4xbf16>
    %41 = vector.extract_strided_slice %17 {offsets = [0, 4], sizes = [8, 4], strides = [1, 1]} : vector<8x16xbf16> to vector<8x4xbf16>
    %42 = vector.extract_strided_slice %18 {offsets = [0, 8], sizes = [8, 8], strides = [1, 1]} : vector<8x32xbf16> to vector<8x8xbf16>
    %cst_19 = arith.constant dense<0.000000e+00> : vector<8x8xf32>
    %43 = tpu.matmul %40, %41, %cst_19 {dimension_numbers = #tpu.dot_dimension_numbers<[1], [1], [0], [0], [0, 0, 1, 0], [], []>} : vector<8x4xbf16>, vector<8x4xbf16>, vector<8x8xf32> -> vector<8x8xf32>
    %44 = arith.addf %43, %22 : vector<8x8xf32>
    %cst_20 = arith.constant dense<0xFF800000> : vector<8xf32>
    %45 = vector.multi_reduction <maximumf>, %44, %cst_20 [1] : vector<8x8xf32> to vector<8xf32>
    %46 = vector.shape_cast %45 : vector<8xf32> to vector<8x1xf32>
    %47 = vector.broadcast %46 : vector<8x1xf32> to vector<8x8xf32>
    %48 = arith.subf %44, %47 : vector<8x8xf32>
    %49 = math.exp %48 : vector<8x8xf32>
    %cst_21 = arith.constant dense<0.000000e+00> : vector<8xf32>
    %50 = vector.multi_reduction <add>, %49, %cst_21 [1] : vector<8x8xf32> to vector<8xf32>
    %51 = vector.shape_cast %50 : vector<8xf32> to vector<8x1xf32>
    %52 = tpu.reciprocal %51 {approx = true} : vector<8x1xf32> -> vector<8x1xf32>
    %53 = vector.broadcast %52 : vector<8x1xf32> to vector<8x8xf32>
    %54 = arith.mulf %49, %53 : vector<8x8xf32>
    %55 = arith.truncf %54 : vector<8x8xf32> to vector<8x8xbf16>
    %cst_22 = arith.constant dense<0.000000e+00> : vector<8x8xf32>
    %56 = tpu.matmul %55, %42, %cst_22 {dimension_numbers = #tpu.dot_dimension_numbers<[1], [0], [0], [1], [0, 0, 1, 1], [], []>} : vector<8x8xbf16>, vector<8x8xbf16>, vector<8x8xf32> -> vector<8x8xf32>
    %57 = tpu.concatenate %39, %56 in 1 : vector<8x8xf32>, vector<8x8xf32> -> vector<8x16xf32>
    %c0_23 = arith.constant 0 : index
    %c0_24 = arith.constant 0 : index
    %c0_25 = arith.constant 0 : index
    %58 = vector.load %arg10[%c0_23, %c0_24, %c0_25] : memref<1x8x32xf32, #tpu.memory_space<vmem>>, vector<1x8x16xf32>
    %59 = vector.shape_cast %58 : vector<1x8x16xf32> to vector<8x16xf32>
    %60 = vector.shape_cast %57 : vector<8x16xf32> to vector<1x8x16xf32>
    tpu.vector_store %arg10[%c0_23, %c0_24, %c0_25], %60 {strides = array<i32>} : memref<1x8x32xf32, #tpu.memory_space<vmem>>, vector<1x8x16xf32>,
    %61 = vector.extract_strided_slice %16 {offsets = [0, 8], sizes = [8, 4], strides = [1, 1]} : vector<8x16xbf16> to vector<8x4xbf16>
    %62 = vector.extract_strided_slice %17 {offsets = [0, 8], sizes = [8, 4], strides = [1, 1]} : vector<8x16xbf16> to vector<8x4xbf16>
    %63 = vector.extract_strided_slice %18 {offsets = [0, 16], sizes = [8, 8], strides = [1, 1]} : vector<8x32xbf16> to vector<8x8xbf16>
    %cst_26 = arith.constant dense<0.000000e+00> : vector<8x8xf32>
    %64 = tpu.matmul %61, %62, %cst_26 {dimension_numbers = #tpu.dot_dimension_numbers<[1], [1], [0], [0], [0, 0, 1, 0], [], []>} : vector<8x4xbf16>, vector<8x4xbf16>, vector<8x8xf32> -> vector<8x8xf32>
    %65 = arith.addf %64, %22 : vector<8x8xf32>
    %cst_27 = arith.constant dense<0xFF800000> : vector<8xf32>
    %66 = vector.multi_reduction <maximumf>, %65, %cst_27 [1] : vector<8x8xf32> to vector<8xf32>
    %67 = vector.shape_cast %66 : vector<8xf32> to vector<8x1xf32>
    %68 = vector.broadcast %67 : vector<8x1xf32> to vector<8x8xf32>
    %69 = arith.subf %65, %68 : vector<8x8xf32>
    %70 = math.exp %69 : vector<8x8xf32>
    %cst_28 = arith.constant dense<0.000000e+00> : vector<8xf32>
    %71 = vector.multi_reduction <add>, %70, %cst_28 [1] : vector<8x8xf32> to vector<8xf32>
    %72 = vector.shape_cast %71 : vector<8xf32> to vector<8x1xf32>
    %73 = tpu.reciprocal %72 {approx = true} : vector<8x1xf32> -> vector<8x1xf32>
    %74 = vector.broadcast %73 : vector<8x1xf32> to vector<8x8xf32>
    %75 = arith.mulf %70, %74 : vector<8x8xf32>
    %76 = arith.truncf %75 : vector<8x8xf32> to vector<8x8xbf16>
    %cst_29 = arith.constant dense<0.000000e+00> : vector<8x8xf32>
    %77 = tpu.matmul %76, %63, %cst_29 {dimension_numbers = #tpu.dot_dimension_numbers<[1], [0], [0], [1], [0, 0, 1, 1], [], []>} : vector<8x8xbf16>, vector<8x8xbf16>, vector<8x8xf32> -> vector<8x8xf32>
    %78 = vector.extract_strided_slice %16 {offsets = [0, 12], sizes = [8, 4], strides = [1, 1]} : vector<8x16xbf16> to vector<8x4xbf16>
    %79 = vector.extract_strided_slice %17 {offsets = [0, 12], sizes = [8, 4], strides = [1, 1]} : vector<8x16xbf16> to vector<8x4xbf16>
    %80 = vector.extract_strided_slice %18 {offsets = [0, 24], sizes = [8, 8], strides = [1, 1]} : vector<8x32xbf16> to vector<8x8xbf16>
    %cst_30 = arith.constant dense<0.000000e+00> : vector<8x8xf32>
    %81 = tpu.matmul %78, %79, %cst_30 {dimension_numbers = #tpu.dot_dimension_numbers<[1], [1], [0], [0], [0, 0, 1, 0], [], []>} : vector<8x4xbf16>, vector<8x4xbf16>, vector<8x8xf32> -> vector<8x8xf32>
    %82 = arith.addf %81, %22 : vector<8x8xf32>
    %cst_31 = arith.constant dense<0xFF800000> : vector<8xf32>
    %83 = vector.multi_reduction <maximumf>, %82, %cst_31 [1] : vector<8x8xf32> to vector<8xf32>
    %84 = vector.shape_cast %83 : vector<8xf32> to vector<8x1xf32>
    %85 = vector.broadcast %84 : vector<8x1xf32> to vector<8x8xf32>
    %86 = arith.subf %82, %85 : vector<8x8xf32>
    %87 = math.exp %86 : vector<8x8xf32>
    %cst_32 = arith.constant dense<0.000000e+00> : vector<8xf32>
    %88 = vector.multi_reduction <add>, %87, %cst_32 [1] : vector<8x8xf32> to vector<8xf32>
    %89 = vector.shape_cast %88 : vector<8xf32> to vector<8x1xf32>
    %90 = tpu.reciprocal %89 {approx = true} : vector<8x1xf32> -> vector<8x1xf32>
    %91 = vector.broadcast %90 : vector<8x1xf32> to vector<8x8xf32>
    %92 = arith.mulf %87, %91 : vector<8x8xf32>
    %93 = arith.truncf %92 : vector<8x8xf32> to vector<8x8xbf16>
    %cst_33 = arith.constant dense<0.000000e+00> : vector<8x8xf32>
    %94 = tpu.matmul %93, %80, %cst_33 {dimension_numbers = #tpu.dot_dimension_numbers<[1], [0], [0], [1], [0, 0, 1, 1], [], []>} : vector<8x8xbf16>, vector<8x8xbf16>, vector<8x8xf32> -> vector<8x8xf32>
    %95 = tpu.concatenate %77, %94 in 1 : vector<8x8xf32>, vector<8x8xf32> -> vector<8x16xf32>
    %c0_34 = arith.constant 0 : index
    %c0_35 = arith.constant 0 : index
    %c16 = arith.constant 16 : index
    %96 = vector.load %arg10[%c0_34, %c0_35, %c16] : memref<1x8x32xf32, #tpu.memory_space<vmem>>, vector<1x8x16xf32>
    %97 = vector.shape_cast %96 : vector<1x8x16xf32> to vector<8x16xf32>
    %98 = vector.shape_cast %95 : vector<8x16xf32> to vector<1x8x16xf32>
    tpu.vector_store %arg10[%c0_34, %c0_35, %c16], %98 {strides = array<i32>} : memref<1x8x32xf32, #tpu.memory_space<vmem>>, vector<1x8x16xf32>,
    return
  }
  func.func @transform_0(%arg0: i32, %arg1: i32) -> (i32, i32, i32) {
    %c0_i32 = arith.constant 0 : i32
    %c0_i32_0 = arith.constant 0 : i32
    %c0_i32_1 = arith.constant 0 : i32
    return %arg0, %c0_i32, %c0_i32_0 : i32, i32, i32
  }
  func.func @transform_1(%arg0: i32, %arg1: i32) -> (i32, i32, i32, i32) {
    %c0_i32 = arith.constant 0 : i32
    %c0_i32_0 = arith.constant 0 : i32
    %c0_i32_1 = arith.constant 0 : i32
    %c0_i32_2 = arith.constant 0 : i32
    return %arg0, %c0_i32, %c0_i32_0, %c0_i32_1 : i32, i32, i32, i32
  }
  func.func @transform_2(%arg0: i32, %arg1: i32) -> (i32, i32) {
    %c0_i32 = arith.constant 0 : i32
    %c0_i32_0 = arith.constant 0 : i32
    %c0_i32_1 = arith.constant 0 : i32
    return %c0_i32, %c0_i32_0 : i32, i32
  }
  func.func @transform_3(%arg0: i32, %arg1: i32) -> (i32, i32) {
    %c0_i32 = arith.constant 0 : i32
    %c0_i32_0 = arith.constant 0 : i32
    %c0_i32_1 = arith.constant 0 : i32
    return %c0_i32, %c0_i32_0 : i32, i32
  }
  func.func @transform_4(%arg0: i32, %arg1: i32) -> (i32, i32) {
    %c0_i32 = arith.constant 0 : i32
    %c0_i32_0 = arith.constant 0 : i32
    %c0_i32_1 = arith.constant 0 : i32
    return %c0_i32, %c0_i32_0 : i32, i32
  }
  func.func @transform_5(%arg0: i32, %arg1: i32) -> (i32, i32) {
    %c0_i32 = arith.constant 0 : i32
    %c0_i32_0 = arith.constant 0 : i32
    %c0_i32_1 = arith.constant 0 : i32
    return %c0_i32, %c0_i32_0 : i32, i32
  }
  func.func @transform_6(%arg0: i32, %arg1: i32) -> (i32, i32) {
    %c0_i32 = arith.constant 0 : i32
    %c0_i32_0 = arith.constant 0 : i32
    %c0_i32_1 = arith.constant 0 : i32
    return %c0_i32, %c0_i32_0 : i32, i32
  }
  func.func @transform_7(%arg0: i32, %arg1: i32) -> (i32, i32) {
    %c0_i32 = arith.constant 0 : i32
    %c0_i32_0 = arith.constant 0 : i32
    %c0_i32_1 = arith.constant 0 : i32
    return %c0_i32, %c0_i32_0 : i32, i32
  }
  func.func @transform_8(%arg0: i32, %arg1: i32) -> (i32, i32, i32) {
    %c0_i32 = arith.constant 0 : i32
    %c0_i32_0 = arith.constant 0 : i32
    return %arg0, %arg1, %c0_i32 : i32, i32, i32
  }
}

</mosaic_0001>

<bundles_post_ra>
// kernel: tpu_custom_call.1
= control target key start
LH: loop header
LB: loop body
LE: loop exit
PB: predicated region body
PF: predicated region fallthrough
CT: control target
= control target key end

     0   :  { %s2474_s0 = inlined_call_operand.hbm [shape: f32[2,8,32], index: 0, kind: input, shape index: {}]   ;;  %s2475_s1 = inlined_call_operand.hbm [shape: f32[2,1,1,8], index: 1, kind: input, shape index: {}]   ;;  %s2476_s2 = inlined_call_operand.hbm [shape: bf16[32,16], index: 2, kind: input, shape index: {}]   ;;  %s2477_s3 = inlined_call_operand.hbm [shape: f32[1,16], index: 3, kind: input, shape index: {}]   ;;  %s2478_s4 = inlined_call_operand.hbm [shape: bf16[32,16], index: 4, kind: input, shape index: {}]   ;;  %s2479_s5 = inlined_call_operand.hbm [shape: f32[1,16], index: 5, kind: input, shape index: {}]   ;;  %s2480_s6 = inlined_call_operand.hbm [shape: bf16[32,32], index: 6, kind: input, shape index: {}]   ;;  %s2481_s7 = inlined_call_operand.hbm [shape: f32[1,32], index: 7, kind: input, shape index: {}]   ;;  %s2482_s8 = inlined_call_operand.hbm [shape: f32[2,8,32], index: 8, kind: output, shape index: {}]  }
   0x1   :  { %2490 = sst [smem:[#allocation27_spill]] %s2474_s0 }
   0x2   :  { %2491 = sst [smem:[#allocation28_spill]] %s2476_s2 }
   0x3   :  { %2492 = sst [smem:[#allocation29_spill]] %s2477_s3 }
   0x4   :  { %2493 = sst [smem:[#allocation30_spill]] %s2482_s8 }
   0x5   :  { %13 = vsyncpa [#allocation5], 0 }
   0x6   :  { %15 = vsyncpa [#allocation5 + $0x1], 0 }
   0x7   :  { %16 = vsyncpa [#allocation8], 0 }
   0x8   :  { %18 = vsyncpa [#allocation8 + $0x1], 0 }
   0x9   :  { %19 = vsyncpa [#allocation11], 0 }
   0xa   :  { %20 = vsyncpa [#allocation14], 0 }
   0xb   :  { %21 = vsyncpa [#allocation17], 0 }
   0xc   :  { %22 = vsyncpa [#allocation6], 0 }
   0xd   :  { %24 = vsyncpa [#allocation6 + $0x1], 0  ;;  %s2016_s27 = smov 0   ;;  %s2018_s28 = smov 0  }
   0xe   :  { %s2020_s29 = smov 0   ;;  %s2022_s30 = smov 0  }
   0xf   :  { %s2024_s9 = smov 0   ;;  %s2026_s10 = smov 0  }
  0x10 LB: > { %2494 = sst [smem:[#allocation26_spill]] %s1941_s30  ;;  %s2047_s11 = sadd.s32 4294967295, %s1949_s10   ;;  %s1949_s10 = sphi %s2026_s10, %s30_s10   ;;  %s1945_s9 = sphi %s2024_s9, %s2528_s9   ;;  %s1941_s30 = sphi %s2022_s30, %s2527_s30   ;;  %s1937_s29 = sphi %s2020_s29, %s2526_s29   ;;  %s1933_s28 = sphi %s2018_s28, %s2525_s28   ;;  %s1929_s27 = sphi %s2016_s27, %s2524_s27  }
  0x11   : > { %p1312_p0 = scmp.ge.s32.totalorder %s1949_s10, 1  ;;  %p2484_p1 = scmp.eq.s32.totalorder %s2047_s11, 0 }
  0x12   : > { %p253_p2 = scmp.lt.s32.totalorder %s1949_s10, 3  ;;  %s1951_s13 = smov [#allocation9]  }
  0x13   : > { %s265_s14 = sshll.u32 %s1951_s13, 4  ;;  %s1952_s16 = smov [#allocation10]   ;;  %s2056_s14 = int_to_ptr.vmem [resolvable:$true] %s265_s14 }
  0x14   : > { %p2052_p3 = pnand %p1312_p0, %p253_p2  ;;  %s279_s17 = sshll.u32 %s1952_s16, 4  ;;  %s2067_s17 = int_to_ptr.vmem [resolvable:$true] %s279_s17 }
  0x15   : > { %s1953_s18 = smov [#allocation13]   ;;  %s2497_s2 = sld [smem:[#allocation28_spill]] }
  0x16   : > { %s2495_s12 = scalar_select %p2052_p3, 1, 0 }
  0x17   : > { %p1486_p4 = pneg %p2052_p3  ;;  %s2069_s19 = sshll.u32 %s1953_s18, 4  ;;  %s304_s19 = int_to_ptr.vmem [resolvable:$true] %s2069_s19 }
  0x19   : > { %p2063_p6 = pnand %p1486_p4, %p2484_p1 }
  0x1b   : > { %s1619_s22 = scalar_lea.hbm %s2497_s2, 256  ;;  %p2079_p8 = pneg %p2063_p6 }
  0x1c   : > { %p1620_p7 = scmp.ne.s32.totalorder %s2497_s2, %s1619_s22  ;;  %p1626_p11 = scmp.lt.u32.totalorder %s1619_s22, %s2497_s2 }
  0x1e   : > { %p1622_p9 = pnand %p2079_p8, %p1620_p7 }
  0x20   : > { %p1623_p10 = pneg %p1622_p9 }
  0x22   : > { %p1628_p12 = pnand %p1626_p11, %p1623_p10 }
  0x24   : > { %1631 = shalt.err (!%p1628_p12)
}
  0x25   : > { %s1632_s16 = scalar_lea.vmem %s2056_s14, 256  ;;  %p1640_p4 = scmp.lt.s32.totalorder %s2056_s14, %s2056_s14 }
  0x26   : > { %p1633_p13 = scmp.ne.s32.totalorder %s2056_s14, %s1632_s16  ;;  %p1641_p5 = scmp.lt.s32.totalorder %s1632_s16, %s1632_s16 }
  0x28   : > { %p1635_p0 = pnand %p1633_p13, %p2079_p8  ;;  %p1642_p7 = por %p1641_p5, %p1640_p4 }
  0x2a   : > { %p1636_p2 = pneg %p1635_p0 }
  0x2c   : > { %p1643_p9 = pnand %p1642_p7, %p1636_p2 }
  0x2e   : > { %1646 = shalt.err (!%p1643_p9)
}
  0x2f   : > { %s2486_s18 = smov 64   ;;  %s1955_s20 = smov 4  }
  0x30   : > { %1489 = dma.hbm_to_vmem [thread:$0]  (!%p2063_p6), %s2497_s2, 256, %s2056_s14, [#allocation8], %s2486_s18, %s2486_s18, %s1955_s20  }
  0x31   : > { %s2499_s3 = sld [smem:[#allocation29_spill]] }
  0x37   : > { %s1647_s26 = scalar_lea.hbm %s2499_s3, 16 }
  0x38   : > { %p1648_p5 = scmp.ne.s32.totalorder %s2499_s3, %s1647_s26  ;;  %p1654_p12 = scmp.lt.u32.totalorder %s1647_s26, %s2499_s3 }
  0x3a   : > { %p1650_p10 = pnand %p1648_p5, %p2079_p8 }
  0x3c   : > { %p1651_p11 = pneg %p1650_p10 }
  0x3e   : > { %p1656_p13 = pnand %p1654_p12, %p1651_p11 }
  0x40   : > { %1659 = shalt.err (!%p1656_p13)
}
  0x41   : > { %s1660_s14 = scalar_lea.vmem %s2067_s17, 16  ;;  %s1667_s21 = scalar_lea.vmem %s2067_s17, 32 }
  0x42   : > { %p1661_p0 = scmp.ne.s32.totalorder %s2067_s17, %s1660_s14  ;;  %p1668_p7 = scmp.lt.s32.totalorder %s2067_s17, %s2067_s17 }
  0x43   : > { %p1669_p9 = scmp.lt.s32.totalorder %s1667_s21, %s1660_s14 }
  0x44   : > { %p1663_p2 = pnand %p1661_p0, %p2079_p8 }
  0x45   : > { %p1670_p5 = por %p1669_p9, %p1668_p7 }
  0x46   : > { %p1664_p4 = pneg %p1663_p2 }
  0x48   : > { %p1671_p10 = pnand %p1670_p5, %p1664_p4 }
  0x4a   : > { %1674 = shalt.err (!%p1671_p10)
}
  0x4b   : > { %1492 = dma.hbm_to_vmem [thread:$0]  (!%p2063_p6), %s2499_s3, 16, %s2067_s17, [#allocation11]  }
  0x4c   : > { %s1675_s24 = scalar_lea.hbm %s2479_s5, 16 }
  0x4d   : > { %p1676_p11 = scmp.ne.s32.totalorder %s2479_s5, %s1675_s24  ;;  %p1682_p0 = scmp.lt.u32.totalorder %s1675_s24, %s2479_s5 }
  0x4f   : > { %p1678_p12 = pnand %p1676_p11, %p2079_p8 }
  0x51   : > { %p1679_p13 = pneg %p1678_p12 }
  0x53   : > { %p1684_p2 = pnand %p1682_p0, %p1679_p13 }
  0x55   : > { %1687 = shalt.err (!%p1684_p2)
}
  0x56   : > { %s1688_s21 = scalar_lea.vmem %s304_s19, 16  ;;  %s1695_s17 = scalar_lea.vmem %s304_s19, 32 }
  0x57   : > { %p1689_p4 = scmp.ne.s32.totalorder %s304_s19, %s1688_s21  ;;  %p1696_p5 = scmp.lt.s32.totalorder %s304_s19, %s304_s19 }
  0x58   : > { %p1697_p10 = scmp.lt.s32.totalorder %s1695_s17, %s1688_s21 }
  0x59   : > { %p1691_p7 = pnand %p1689_p4, %p2079_p8 }
  0x5a   : > { %p1698_p1 = por %p1697_p10, %p1696_p5 }
  0x5b   : > { %p1692_p9 = pneg %p1691_p7 }
  0x5d   : > { %p1699_p3 = pnand %p1698_p1, %p1692_p9 }
  0x5f   : > { %1702 = shalt.err (!%p1699_p3)
}
  0x60   : > { %1498 = dma.hbm_to_vmem [thread:$0]  (!%p2063_p6), %s2479_s5, 16, %s304_s19, [#allocation14]  }
  0x61   : > { %s1956_s22 = smov [#allocation12]   ;;  %s1957_s24 = smov [#allocation15]  }
  0x62   : > { %s289_s23 = sshll.u32 %s1956_s22, 4  ;;  %s313_s26 = sshll.u32 %s1957_s24, 4  ;;  %s290_s23 = int_to_ptr.vmem [resolvable:$true] %s289_s23  ;;  %s314_s26 = int_to_ptr.vmem [resolvable:$true] %s313_s26 }
  0x63   : > { %s1703_s14 = scalar_lea.hbm %s2478_s4, 256 }
  0x64   : > { %p1704_p1 = scmp.ne.s32.totalorder %s2478_s4, %s1703_s14  ;;  %p1710_p12 = scmp.lt.u32.totalorder %s1703_s14, %s2478_s4 }
  0x66   : > { %p1706_p3 = pnand %p1704_p1, %p2079_p8 }
  0x68   : > { %p1707_p11 = pneg %p1706_p3 }
  0x6a   : > { %p1712_p13 = pnand %p1710_p12, %p1707_p11 }
  0x6c   : > { %1715 = shalt.err (!%p1712_p13)
}
  0x6d   : > { %s1716_s19 = scalar_lea.vmem %s290_s23, 256  ;;  %p1724_p7 = scmp.lt.s32.totalorder %s290_s23, %s290_s23 }
  0x6e   : > { %p1717_p0 = scmp.ne.s32.totalorder %s290_s23, %s1716_s19  ;;  %p1725_p9 = scmp.lt.s32.totalorder %s1716_s19, %s1716_s19 }
  0x70   : > { %p1719_p2 = pnand %p1717_p0, %p2079_p8  ;;  %p1726_p5 = por %p1725_p9, %p1724_p7 }
  0x72   : > { %p1720_p4 = pneg %p1719_p2 }
  0x74   : > { %p1727_p10 = pnand %p1726_p5, %p1720_p4 }
  0x76   : > { %1730 = shalt.err (!%p1727_p10)
}
  0x77   : > { %s2500_s30 = smov 64   ;;  %s1731_s16 = scalar_lea.hbm %s2480_s6, 256 }
  0x78   : > { %1495 = dma.hbm_to_vmem [thread:$0]  (!%p2063_p6), %s2478_s4, 256, %s290_s23, [#allocation11], %s2500_s30, %s2500_s30, %s1955_s20  }
  0x79   : > { %p1732_p1 = scmp.ne.s32.totalorder %s2480_s6, %s1731_s16  ;;  %p1738_p12 = scmp.lt.u32.totalorder %s1731_s16, %s2480_s6 }
  0x7b   : > { %p1734_p3 = pnand %p1732_p1, %p2079_p8 }
  0x7d   : > { %p1735_p11 = pneg %p1734_p3 }
  0x7f   : > { %p1740_p13 = pnand %p1738_p12, %p1735_p11 }
  0x81   : > { %1743 = shalt.err (!%p1740_p13)
}
  0x82   : > { %s1744_s19 = scalar_lea.vmem %s314_s26, 256  ;;  %p1752_p7 = scmp.lt.s32.totalorder %s314_s26, %s314_s26 }
  0x83   : > { %p1745_p0 = scmp.ne.s32.totalorder %s314_s26, %s1744_s19  ;;  %p1753_p9 = scmp.lt.s32.totalorder %s1744_s19, %s1744_s19 }
  0x85   : > { %p1747_p2 = pnand %p1745_p0, %p2079_p8  ;;  %p1754_p5 = por %p1753_p9, %p1752_p7 }
  0x87   : > { %p1748_p4 = pneg %p1747_p2 }
  0x89   : > { %p1755_p10 = pnand %p1754_p5, %p1748_p4 }
  0x8b   : > { %1758 = shalt.err (!%p1755_p10)
}
  0x8c   : > { %1501 = dma.hbm_to_vmem [thread:$0]  (!%p2063_p6), %s2480_s6, 256, %s314_s26, [#allocation14], %s2500_s30, %s2500_s30, %s1955_s20  }
  0x8d   : > { %s1958_s22 = smov [#allocation16]   ;;  %s1759_s14 = scalar_lea.hbm %s2481_s7, 16 }
  0x8e   : > { %s327_s24 = sshll.u32 %s1958_s22, 4  ;;  %p1760_p1 = scmp.ne.s32.totalorder %s2481_s7, %s1759_s14  ;;  %s328_s24 = int_to_ptr.vmem [resolvable:$true] %s327_s24 }
  0x8f   : > { %p1766_p12 = scmp.lt.u32.totalorder %s1759_s14, %s2481_s7 }
  0x90   : > { %p1762_p3 = pnand %p1760_p1, %p2079_p8 }
  0x92   : > { %p1763_p11 = pneg %p1762_p3 }
  0x94   : > { %p1768_p13 = pnand %p1766_p12, %p1763_p11 }
  0x96   : > { %1771 = shalt.err (!%p1768_p13)
}
  0x97   : > { %s1772_s20 = scalar_lea.vmem %s328_s24, 16  ;;  %s1779_s26 = scalar_lea.vmem %s328_s24, 32 }
  0x98   : > { %p1773_p0 = scmp.ne.s32.totalorder %s328_s24, %s1772_s20  ;;  %p1780_p7 = scmp.lt.s32.totalorder %s328_s24, %s328_s24 }
  0x99   : > { %p1781_p9 = scmp.lt.s32.totalorder %s1779_s26, %s1772_s20 }
  0x9a   : > { %p1775_p2 = pnand %p1773_p0, %p2079_p8 }
  0x9b   : > { %p1782_p5 = por %p1781_p9, %p1780_p7 }
  0x9c   : > { %p1776_p4 = pneg %p1775_p2 }
  0x9e   : > { %p1783_p10 = pnand %p1782_p5, %p1776_p4 }
  0xa0   : > { %1786 = shalt.err (!%p1783_p10)
}
  0xa1   : > { %1504 = dma.hbm_to_vmem [thread:$0]  (!%p2063_p6), %s2481_s7, 16, %s328_s24, [#allocation17]  }
  0xa2   : > { %s1311_s25 = sadd.s32 4294967294, %s1949_s10   ;;  %s42_s18 = sadd.s32 1, %s1945_s9 }
  0xa3   : > { %p44_p8 = scmp.ge.s32.totalorder %s42_s18, 2  ;;  %s49_s15 = sadd.s32 1, %s1937_s29 }
  0xa4   : > { %p56_p1 = scmp.ne.s32.totalorder %s1937_s29, %s1933_s28  ;;  %p57_p3 = scmp.eq.s32.totalorder %s1949_s10, 0 }
  0xa5   : > { %s2530_s18 = smov (%p44_p8, %s42_s18), 0  ;;  %p62_p12 = scmp.ne.s32.totalorder %s1933_s28, %s1929_s27 }
  0xa6   : > { %p2214_p11 = por %p57_p3, %p56_p1  ;;  %s46_s24 = ssub.s32 %s1945_s9, %s2530_s18 }
  0xa7   : > { %p240_p6 = scmp.eq.s32.totalorder %s2047_s11, 1  ;;  %p47_p13 = scmp.eq.s32.totalorder %s46_s24, 0 }
  0xa8   : > { %p2502_p0 = scmp.eq.s32.totalorder %s2047_s11, 0  ;;  %p246_p7 = scmp.eq.s32.totalorder %s1311_s25, 1 }
  0xa9   : > { %p2229_p4 = por %p240_p6, %p56_p1  ;;  %p1522_p5 = scmp.lt.s32.totalorder %s1949_s10, 2 }
  0xaa   : > { %p2225_p2 = por %p2502_p0, %p62_p12  ;;  %p2236_p9 = por %p246_p7, %p62_p12 }
  0xab   : > { %s2504_s16 = scalar_select %p2229_p4, 1, 0 }
  0xac   : > { %s2503_s13 = scalar_select %p2225_p2, 1, 0 }
  0xad   : > { %s2234_s14 = scalar_select %p47_p13, %s1937_s29, %s49_s15  }
  0xae   : > { %s2505_s21 = scalar_select %p2236_p9, 1, 0 }
  0xaf   : > { %s2242_s17 = sand.u32 1, %s1937_s29   ;;  %s1321_s8 = sshll.u32 %s1945_s9, 7 }
  0xb0   : > { %s1320_s19 = sshll.u32 %s2242_s17, 3  ;;  %s2506_s0 = sld [smem:[#allocation27_spill]] }
  0xb1   : > { %s342_s23 = scalar_lea.vmem [#allocation4], %s1320_s19  ;;  %p2253_p10 = pnand %p1522_p5, %p2214_p11 }
  0xb2   : > { %s349_s25 = sshll.u32 %s342_s23, 4  ;;  %s339_s2 = scalar_lea.sflag [#allocation5], %s2242_s17  ;;  %s2257_s25 = int_to_ptr.vmem [resolvable:$true] %s349_s25 }
  0xb3   : > { %p1789_p1 = pneg %p2253_p10 }
  0xb6   : > { %s2249_s30 = scalar_lea.hbm %s2506_s0, %s1321_s8  ;;  %s1792_s19 = scalar_lea.hbm %s2506_s0, 256 }
  0xb7   : > { %s1787_s20 = scalar_lea.hbm %s2249_s30, 128  ;;  %p1793_p11 = scmp.lt.u32.totalorder %s2249_s30, %s2506_s0 }
  0xb8   : > { %p1788_p8 = scmp.ne.s32.totalorder %s2249_s30, %s1787_s20  ;;  %p1794_p6 = scmp.lt.u32.totalorder %s1792_s19, %s1787_s20 }
  0xb9   : > { %p1796_p0 = scmp.lt.u32.totalorder %s1787_s20, %s2249_s30 }
  0xba   : > { %p1790_p3 = pnand %p1789_p1, %p1788_p8  ;;  %p1795_p13 = por %p1794_p6, %p1793_p11 }
  0xbc   : > { %p1791_p12 = pneg %p1790_p3  ;;  %p1797_p7 = por %p1796_p0, %p1795_p13 }
  0xbe   : > { %p1798_p5 = pnand %p1797_p7, %p1791_p12 }
  0xc0   : > { %1801 = shalt.err (!%p1798_p5)
}
  0xc1   : > { %s1802_s24 = scalar_lea.vmem %s2257_s25, 128  ;;  %s1959_s8 = smov [#allocation4]  }
  0xc2   : > { %p1803_p8 = scmp.ne.s32.totalorder %s2257_s25, %s1802_s24  ;;  %s1807_s22 = sshll.u32 %s1959_s8, 4  ;;  %s1808_s22 = int_to_ptr.vmem [resolvable:$false] %s1807_s22 }
  0xc3   : > { %s1809_s26 = scalar_lea.vmem %s1808_s22, 256  ;;  %p1810_p4 = scmp.lt.s32.totalorder %s2257_s25, %s1808_s22 }
  0xc4   : > { %p1805_p3 = pnand %p1803_p8, %p1789_p1  ;;  %p1811_p11 = scmp.lt.s32.totalorder %s1809_s26, %s1802_s24 }
  0xc6   : > { %p1806_p9 = pneg %p1805_p3  ;;  %p1812_p6 = por %p1811_p11, %p1810_p4 }
  0xc8   : > { %p1813_p13 = pnand %p1812_p6, %p1806_p9 }
  0xca   : > { %1816 = shalt.err (!%p1813_p13)
}
  0xcb   : > { %1508 = dma.hbm_to_vmem [thread:$0]  (!%p2253_p10), %s2249_s30, 128, %s2257_s25, %s339_s2  }
  0xcc   : > { %s1322_s20 = sshll.u32 %s1945_s9, 4  ;;  %s359_s24 = scalar_lea.vmem [#allocation7], %s2242_s17 }
  0xcd   : > { %s2290_s8 = scalar_lea.hbm %s2475_s1, %s1322_s20  ;;  %s366_s22 = sshll.u32 %s359_s24, 4  ;;  %s367_s22 = int_to_ptr.vmem [resolvable:$true] %s366_s22 }
  0xce   : > { %s2508_s26 = sand.u32 1, %s1949_s10   ;;  %s1817_s3 = scalar_lea.hbm %s2290_s8, 16 }
  0xcf   : > { %s357_s0 = scalar_lea.sflag [#allocation8], %s2508_s26  ;;  %p1818_p4 = scmp.ne.s32.totalorder %s2290_s8, %s1817_s3 }
  0xd0   : > { %s1822_s25 = scalar_lea.hbm %s2475_s1, 32  ;;  %p1823_p0 = scmp.lt.u32.totalorder %s2290_s8, %s2475_s1 }
  0xd1   : > { %p1820_p9 = pnand %p1818_p4, %p1789_p1  ;;  %p1824_p7 = scmp.lt.u32.totalorder %s1822_s25, %s1817_s3 }
  0xd2   : > { %p1826_p8 = scmp.lt.u32.totalorder %s1817_s3, %s2290_s8 }
  0xd3   : > { %p1821_p12 = pneg %p1820_p9  ;;  %p1825_p5 = por %p1824_p7, %p1823_p0 }
  0xd5   : > { %p1827_p3 = por %p1826_p8, %p1825_p5 }
  0xd7   : > { %p1828_p11 = pnand %p1827_p3, %p1821_p12 }
  0xd9   : > { %1831 = shalt.err (!%p1828_p11)
}
  0xda   : > { %s1832_s17 = scalar_lea.vmem %s367_s22, 16  ;;  %s1960_s23 = smov [#allocation7]  }
  0xdb   : > { %p1833_p6 = scmp.ne.s32.totalorder %s367_s22, %s1832_s17  ;;  %s1837_s24 = sshll.u32 %s1960_s23, 4  ;;  %s1838_s24 = int_to_ptr.vmem [resolvable:$false] %s1837_s24 }
  0xdc   : > { %s1839_s26 = scalar_lea.vmem %s1838_s24, 32  ;;  %p1840_p9 = scmp.lt.s32.totalorder %s367_s22, %s1838_s24 }
  0xdd   : > { %p1835_p13 = pnand %p1833_p6, %p1789_p1  ;;  %p1841_p2 = scmp.lt.s32.totalorder %s1839_s26, %s1832_s17 }
  0xdf   : > { %p1836_p4 = pneg %p1835_p13  ;;  %p1842_p0 = por %p1841_p2, %p1840_p9 }
  0xe1   : > { %p1843_p7 = pnand %p1842_p0, %p1836_p4 }
  0xe3   : > { %1846 = shalt.err (!%p1843_p7)
}
  0xe4   : > { %1511 = dma.hbm_to_vmem [thread:$0]  (!%p2253_p10), %s2290_s8, 16, %s367_s22, %s357_s0  }
  0xe5   : > { %p2509_p12 = scmp.ne.s32.totalorder %s2495_s12, 0 }
  0xe6   : > { %s2317_s3 = sand.u32 (!%p2509_p12), 1, %s1933_s28   ;;  %p2510_p2 = scmp.ne.s32.totalorder (!%p2509_p12), %s2503_s13, 0 }
  0xe7   : > { %375 = sbr.rel (%p2509_p12) target bundleno = 1618 (0x652), region = 52  ;;  %s1324_s2 = sshll.u32 (!%p2509_p12), %s2317_s3, 3 }
  0xe8   : > { %s378_s30 = scalar_lea.sflag (!%p2509_p12), [#allocation5], %s2317_s3  ;;  %s381_s25 = scalar_lea.vmem (!%p2509_p12), [#allocation4], %s1324_s2 }
  0xee   : > { %1900 = dma.done.wait (%p2510_p2), %s378_s30, 128  }
  0xef   : > { %1902 = vsyncadd (%p2510_p2), %s378_s30, 4294967168  ;;  %s386_s0 = sand.u32 1, %s2047_s11   ;;  %s389_s15 = scalar_lea.vmem [#allocation7], %s2317_s3 }
  0xf0   : > { %s387_s12 = scalar_lea.sflag [#allocation8], %s386_s0 }
  0xf1   : > { %1904 = dma.done.wait (%p2510_p2), %s387_s12, 16  }
  0xf2   : > { %1906 = vsyncadd (%p2510_p2), %s387_s12, 4294967280  ;;  %p2511_p10 = scmp.eq.s32.totalorder %s2047_s11, 0 }
  0xf4   : > { %1908 = dma.done.wait (%p2511_p10), [#allocation8], 256   ;;  %p2512_p1 = pmov %p2511_p10 }
  0xf6   : > { %1910 = vsyncadd (%p2512_p1), [#allocation8], 4294967040  ;;  %p2513_p5 = pmov %p2512_p1 }
  0xf7   : > { %p2514_p8 = pmov %p2512_p1 }
  0xf8   : > { %1912 = dma.done.wait (%p2513_p5), [#allocation11], 272  }
  0xf9   : > { %1914 = vsyncadd (%p2514_p8), [#allocation11], 4294967024  ;;  %p2515_p3 = pmov %p2512_p1 }
  0xfa   : > { %p2516_p11 = pmov %p2512_p1 }
  0xfb   : > { %1916 = dma.done.wait (%p2515_p3), [#allocation14], 272  }
  0xfc   : > { %1918 = vsyncadd (%p2516_p11), [#allocation14], 4294967024  ;;  %p2517_p6 = pmov %p2512_p1 }
  0xfd   : > { %p2518_p13 = pmov %p2512_p1 }
  0xfe   : > { %1920 = dma.done.wait (%p2517_p6), [#allocation17], 16  }
  0xff   : > { %1922 = vsyncadd (%p2518_p13), [#allocation17], 4294967280  ;;  %v1961_v0 = vmov 0.0   ;;  %vm1962_vm0 = vmmov 0   ;;  %v1595_v1 = vld [vmem:[#allocation12] sm:$0xff]   ;;  %v1596_v2 = vld [vmem:[#allocation12 + $0x8] sm:$0xff]  }
 0x100   : > { %1384 = vmatprep.subr.bf16.mxu0 %v1961_v0  ;;  %1388 = vmatprep.mubr.msk.bf16.mxu0 %vm1962_vm0, %v1961_v0  ;;  %v455_v3 = vld [vmem:[%s381_s25] sm:$0xff]  ;;  %vm480_vm1 = vcmask 261120   ;;  %v1597_v5 = vld [vmem:[#allocation9] sm:$0xff]   ;;  %vm525_vm2 = vcmask 125952   ;;  %vm675_vm3 = vcmask 31744   ;;  %s1963_s11 = smov 120  }
 0x101   : > { %1392 = vmatprep.subr.bf16.mxu1 %v1961_v0  ;;  %1396 = vmatprep.mubr.msk.bf16.mxu1 %vm1962_vm0, %v1961_v0  ;;  %v456_v4 = vpack.c.bf16 %v455_v3, %v455_v3  ;;  %v1598_v6 = vld [vmem:[#allocation9 + $0x8] sm:$0xff]   ;;  %v1332_v9 = vld [vmem:[#allocation13] ss:$0 sm:$0xff]  ;;  %v1340_v16 = vld [vmem:[#allocation10] ss:$0 sm:$0xff]  ;;  %s1964_s13 = smov 124  }
 0x102   : > { %1385 = vmatpush3.bf16.msra.mxu0 %v1595_v1  ;;  %v1599_v7 = vld [vmem:[#allocation15] sm:$0xff]   ;;  %v1600_v8 = vld [vmem:[#allocation15 + $0x8] sm:$0xff]   ;;  %s1965_s8 = smov 116   ;;  %v1336_v27 = vld [vmem:[#allocation16] ss:$0 sm:$0xff]  ;;  %vm591_vm4 = vcmask 257024  }
 0x103   : > { %1386 = vmatprep.subr.bf16.mxu0 %v1961_v0  ;;  %1393 = vmatpush3.bf16.msra.mxu1 %v1599_v7  ;;  %vm738_vm5 = vcmask 1043456   ;;  %v1344_v45 = vld [vmem:[%s389_s15] ss:$0 sm:$0xff]  ;;  %vm722_vm6 = vcmask 64512   ;;  %s1966_s22 = smov 104   ;;  %s1967_s20 = smov 112  }
 0x104   : > { %1394 = vmatprep.subr.bf16.mxu1 %v1961_v0  ;;  %s1968_s19 = smov 8   ;;  %s2519_s17 = sld [smem:[#allocation26_spill]]  ;;  %vm904_vm7 = vcmask 130048   ;;  %vm1135_vm8 = vcmask 261248  }
 0x105   : > { %s449_s23 = scalar_lea.vmem [#allocation18], %s1324_s2  ;;  %s1969_s24 = smov 16  }
 0x106   : > { %1387 = vmatpush3.bf16.msra.mxu0 %v1596_v2  ;;  %s1152_s30 = sshll.u32 %s449_s23, 4  ;;  %s2520_s12 = sld [smem:[#allocation30_spill]]  ;;  %s2427_s30 = int_to_ptr.vmem [resolvable:$true] %s1152_s30 }
 0x107   : > { %1400 = vmatprep.subr.bf16.mxu0 %v1961_v0  ;;  %1395 = vmatpush3.bf16.msra.mxu1 %v1600_v8  ;;  %s1138_s2 = scalar_lea.sflag [#allocation6], %s2317_s3  ;;  %p2521_p9 = scmp.ne.s32.totalorder %s2504_s16, 0 }
 0x108   : > { %1408 = vmatprep.subr.bf16.mxu1 %v1961_v0 }
 0x109   : > { %1389 = vmatmul.mubr.msk.bf16.vlgmr.msra.gmra.mrb[0].mxu0 %vm480_vm1, %v456_v4 }
 0x10a   : > { %1401 = vmatpush3.bf16.msra.mxu0 %v1597_v5  ;;  %1404 = vmatprep.mubr.msk.bf16.mxu0 %vm1962_vm0, %v1961_v0  ;;  %s1356_s26 = sshll.u32 %s2519_s17, 7 }
 0x10b   : > { %1402 = vmatprep.subr.bf16.mxu0 %v1961_v0  ;;  %1397 = vmatmul.mubr.msk.bf16.vlgmr.msra.gmra.mrb[0].mxu1 %vm480_vm1, %v456_v4 }
 0x10c   : > { %1410 = vmatprep.mubr.msk.bf16.mxu1 %vm1962_vm0, %v1961_v0  ;;  %s2425_s15 = scalar_lea.hbm %s2520_s12, %s1356_s26 }
 0x10e   : > { %1403 = vmatpush3.bf16.msra.mxu0 %v1598_v6 }
 0x10f   : > { %1414 = vmatprep.subr.bf16.mxu0 %v1961_v0 }
 0x111   : > { %1405 = vmatmul.mubr.msk.bf16.vlgmr.msra.gmra.mrb[4].mxu0 %vm480_vm1, %v456_v4 }
 0x112   : > { %1416 = vmatprep.mubr.msk.bf16.mxu0 %vm1962_vm0, %v1961_v0 }
 0x1dc   : > { %v518_v10 = vpop.f32.mrb[0].mxu0 }
 0x1dd   : > { %v519_v11 = vadd.f32 %v1332_v9, %v518_v10  ;;  %v1390_v12 = vpop.f32.mrb[1].mxu0 }
 0x1de   : > { %v521_v13 = vpop.f32.mrb[2].mxu0  ;;  %v584_v28 = vpop.f32.mrb[0].mxu1 }
 0x1df   : > { %v524_v14 = vpack.c.bf16 %v519_v11, %v519_v11  ;;  %v1391_v15 = vpop.f32.mrb[3].mxu0  ;;  %v585_v29 = vadd.f32 %v1336_v27, %v584_v28  ;;  %v1398_v30 = vpop.f32.mrb[1].mxu1 }
 0x1e0   : > { %v587_v31 = vpop.f32.mrb[2].mxu1 }
 0x1e1   : > { %526 = vst.msk [vmem:[#allocation2] sm:$0xf] %vm525_vm2, %v524_v14  ;;  %v590_v32 = vpack.c.bf16 %v585_v29, %v585_v29  ;;  %v1399_v33 = vpop.f32.mrb[3].mxu1 }
 0x1e3   : > { %592 = vst.msk [vmem:[#allocation3] sm:$0xf] %vm591_vm4, %v590_v32 }
 0x1e4   : > { %v658_v17 = vpop.f32.mrb[4].mxu0 }
 0x1e5   : > { %v659_v18 = vadd.f32 %v1340_v16, %v658_v17  ;;  %v1406_v19 = vpop.f32.mrb[5].mxu0 }
 0x1e6   : > { %v661_v20 = vpop.f32.mrb[6].mxu0 }
 0x1e7   : > { %v664_v21 = vmul.f32 0.35355338, %v659_v18  ;;  %v1407_v22 = vpop.f32.mrb[7].mxu0 }
 0x1e8   : > { %v666_v23 = vld [vmem:[#allocation2] sm:$0xf] }
 0x1e9   : > { %v680_v24 = vsel %vm675_vm3, %v666_v23, 0  ;;  %v1347_v25 = vcombine.low %v666_v23, %v666_v23  ;;  %v665_v26 = vpack.c.bf16 %v664_v21, %v664_v21 }
 0x1ea   : > { %1409 = vmatpush3.bf16.xpose.msra.mxu1 %v680_v24  ;;  %v667_v34 = vld [vmem:[#allocation3] sm:$0xf] }
 0x1eb   : > { %908 = vrot.lane.b32.xlu1 %v1347_v25, %s1963_s11  ;;  %788 = vrot.lane.b32.xlu0 %v1347_v25, %s1964_s13  ;;  %v740_v35 = vsel %vm738_vm5, %v667_v34, 0  ;;  %v1349_v12 = vcombine.low %v667_v34, %v667_v34 }
 0x1ec   : > { %1420 = vmatprep.subr.bf16.mxu1 %v1961_v0  ;;  %1415 = vmatpush3.bf16.msra.mxu0 %v740_v35 }
 0x1ed   : > { %1426 = vmatprep.subr.bf16.mxu0 %v1961_v0 }
 0x1ef   : > { %906 = vrot.lane.b32.xlu1 %v665_v26, %s1963_s11  ;;  %783 = vrot.lane.b32.xlu0 %v665_v26, %s1964_s13  ;;  %s1970_s13 = smov [#allocation18]  }
 0x1f1   : > { %1411 = vmatmul.mubr.msk.bf16.vlgmr.msra.gmra.mrb[4].mxu1 %vm675_vm3, %v665_v26 }
 0x1f2   : > { %1422 = vmatprep.mubr.msk.bf16.mxu1 %vm1962_vm0, %v1961_v0 }
 0x1f3   : > { %1016 = vrot.lane.b32.xlu1 %v665_v26, %s1965_s8  ;;  %1018 = vrot.lane.b32.xlu0 %v1347_v25, %s1965_s8  ;;  %s1851_s8 = sshll.u32 %s1970_s13, 4  ;;  %s1852_s8 = int_to_ptr.vmem [resolvable:$false] %s1851_s8 }
 0x1f4   : > { %p1854_p12 = scmp.lt.s32.totalorder %s2427_s30, %s1852_s8 }
 0x25d   : > { %v789_v36 = vpop.permute.xlu0 %788  ;;  %v909_v38 = vpop.permute.xlu1 %908 }
 0x25e   : > { %v794_v37 = vsel %vm675_vm3, %v789_v36, 0  ;;  %v914_v40 = vsel %vm675_vm3, %v909_v38, 0 }
 0x25f   : > { %1421 = vmatpush3.bf16.xpose.msra.mxu1 %v794_v37 }
 0x260   : > { %1432 = vmatprep.subr.bf16.mxu1 %v1961_v0 }
 0x261   : > { %v784_v39 = vpop.permute.xlu0 %783  ;;  %v907_v42 = vpop.permute.xlu1 %906 }
 0x265   : > { %v1019_v41 = vpop.permute.xlu0 %1018  ;;  %v1017_v44 = vpop.permute.xlu1 %1016 }
 0x266   : > { %1423 = vmatmul.mubr.msk.bf16.vlgmr.msra.gmra.mrb[8].mxu1 %vm675_vm3, %v784_v39  ;;  %v1024_v43 = vsel %vm675_vm3, %v1019_v41, 0 }
 0x267   : > { %1433 = vmatpush3.bf16.xpose.msra.mxu1 %v914_v40  ;;  %1434 = vmatprep.mubr.msk.bf16.mxu1 %vm1962_vm0, %v1961_v0 }
 0x268   : > { %1444 = vmatprep.subr.bf16.mxu1 %v1961_v0 }
 0x26e   : > { %1435 = vmatmul.mubr.msk.bf16.vlgmr.msra.gmra.mrb[12].mxu1 %vm675_vm3, %v907_v42 }
 0x26f   : > { %1445 = vmatpush3.bf16.xpose.msra.mxu1 %v1024_v43  ;;  %1446 = vmatprep.mubr.msk.bf16.mxu1 %vm1962_vm0, %v1961_v0 }
 0x276   : > { %1447 = vmatmul.mubr.msk.bf16.vlgmr.msra.gmra.mrb[16].mxu1 %vm675_vm3, %v1017_v44 }
 0x2c4   : > { %v716_v46 = vpop.f32.mrb[4].mxu1 }
 0x2c5   : > { %v717_v47 = vadd.f32 %v1344_v45, %v716_v46  ;;  %v1412_v48 = vpop.f32.mrb[5].mxu1 }
 0x2c6   : > { %v719_v49 = vpop.f32.mrb[6].mxu1 }
 0x2c7   : > { %v1413_v50 = vpop.f32.mrb[7].mxu1  ;;  %v723_v51 = vsel %vm722_vm6, %v717_v47, -inf }
 0x2c8   : > { %724 = vmax.xlane.f32.xlu0 %v723_v51 }
 0x339   : > { %v830_v52 = vpop.f32.mrb[8].mxu1 }
 0x33a   : > { %v831_v53 = vadd.f32 %v1344_v45, %v830_v52  ;;  %v1424_v54 = vpop.f32.mrb[9].mxu1 }
 0x33b   : > { %v833_v55 = vpop.f32.mrb[10].mxu1 }
 0x33c   : > { %v1425_v56 = vpop.f32.mrb[11].mxu1  ;;  %v836_v57 = vsel %vm722_vm6, %v831_v53, -inf }
 0x33d   : > { %837 = vmax.xlane.f32.xlu1 %v836_v57 }
 0x341   : > { %v950_v58 = vpop.f32.mrb[12].mxu1 }
 0x342   : > { %v951_v59 = vadd.f32 %v1344_v45, %v950_v58  ;;  %v1436_v60 = vpop.f32.mrb[13].mxu1 }
 0x343   : > { %v953_v61 = vpop.f32.mrb[14].mxu1 }
 0x344   : > { %v1437_v62 = vpop.f32.mrb[15].mxu1  ;;  %v956_v63 = vsel %vm722_vm6, %v951_v59, -inf }
 0x345   : > { %957 = vmax.xlane.f32.xlu0 %v956_v63 }
 0x349   : > { %v1060_v1 = vpop.f32.mrb[16].mxu1 }
 0x34a   : > { %v1061_v2 = vadd.f32 %v1344_v45, %v1060_v1  ;;  %v1448_v3 = vpop.f32.mrb[17].mxu1 }
 0x34b   : > { %v1063_v4 = vpop.f32.mrb[18].mxu1 }
 0x34c   : > { %v1449_v5 = vpop.f32.mrb[19].mxu1  ;;  %v1066_v6 = vsel %vm722_vm6, %v1061_v2, -inf }
 0x34d   : > { %1067 = vmax.xlane.f32.xlu0 %v1066_v6 }
 0x355   : > { %v725_v7 = vpop.xlane.xlu0 %724 }
 0x356   : > { %v726_v8 = vsub.f32 %v717_v47, %v725_v7 }
 0x358   : > { %v727_v9 = vmul.f32 1.442695, %v726_v8 }
 0x35a   : > { %1603 = vpow2.f32 %v727_v9 }
 0x364   : > { %v1604_v10 = vpop.eup %1603 }
 0x365   : > { %v729_v11 = vsel %vm722_vm6, %v1604_v10, 0.0 }
 0x366   : > { %730 = vadd.xlane.f32.xlu1 %v729_v11 }
 0x377   : > { %851 = vrot.lane.b32.xlu1 %v1349_v12, %s1963_s11  ;;  %s1847_s11 = scalar_lea.vmem %s2427_s30, 128 }
 0x378   : > { %p1848_p4 = scmp.ne.s32.totalorder %s2427_s30, %s1847_s11 }
 0x37a   : > { %p1849_p0 = pnand %p1848_p4, %p2521_p9 }
 0x37c   : > { %p1850_p7 = pneg %p1849_p0 }
 0x3ca   : > { %v838_v13 = vpop.xlane.xlu1 %837 }
 0x3cb   : > { %v839_v14 = vsub.f32 %v831_v53, %v838_v13 }
 0x3cd   : > { %v840_v15 = vmul.f32 1.442695, %v839_v14 }
 0x3cf   : > { %1605 = vpow2.f32 %v840_v15 }
 0x3d2   : > { %v958_v16 = vpop.xlane.xlu0 %957 }
 0x3d3   : > { %v959_v17 = vsub.f32 %v951_v59, %v958_v16 }
 0x3d5   : > { %v960_v18 = vmul.f32 1.442695, %v959_v17 }
 0x3d7   : > { %1607 = vpow2.f32 %v960_v18 }
 0x3d9   : > { %v1606_v19 = vpop.eup %1605 }
 0x3da   : > { %v1068_v20 = vpop.xlane.xlu0 %1067  ;;  %v842_v21 = vsel %vm722_vm6, %v1606_v19, 0.0 }
 0x3db   : > { %v1069_v22 = vsub.f32 %v1061_v2, %v1068_v20  ;;  %843 = vadd.xlane.f32.xlu0 %v842_v21 }
 0x3dd   : > { %v1070_v23 = vmul.f32 1.442695, %v1069_v22 }
 0x3df   : > { %1609 = vpow2.f32 %v1070_v23 }
 0x3e1   : > { %v1608_v24 = vpop.eup %1607 }
 0x3e2   : > { %v962_v25 = vsel %vm722_vm6, %v1608_v24, 0.0 }
 0x3e3   : > { %963 = vadd.xlane.f32.xlu1 %v962_v25 }
 0x3e9   : > { %v1610_v26 = vpop.eup %1609 }
 0x3ea   : > { %v1072_v27 = vsel %vm722_vm6, %v1610_v26, 0.0 }
 0x3eb   : > { %1073 = vadd.xlane.f32.xlu0 %v1072_v27 }
 0x3f3   : > { %v731_v28 = vpop.xlane.xlu1 %730 }
 0x3f4   : > { %1611 = vrcp.f32 %v731_v28  ;;  %1078 = vrot.lane.b32.xlu1 %v1349_v12, %s1966_s22  ;;  %s1853_s22 = scalar_lea.vmem %s1852_s8, 256 }
 0x3f5   : > { %p1855_p2 = scmp.lt.s32.totalorder %s1853_s22, %s1847_s11 }
 0x3f7   : > { %v852_v31 = vpop.permute.xlu1 %851  ;;  %p1856_p10 = por %p1855_p2, %p1854_p12 }
 0x3f8   : > { %v857_v33 = vsel %vm738_vm5, %v852_v31, 0 }
 0x3f9   : > { %p1857_p1 = pnand %p1856_p10, %p1850_p7 }
 0x3fe   : > { %v1612_v29 = vpop.eup %1611 }
 0x3ff   : > { %v733_v30 = vmul.f32 %v1612_v29, %v1604_v10 }
 0x401   : > { %968 = vrot.lane.b32.xlu0 %v1349_v12, %s1967_s20  ;;  %v734_v32 = vpack.c.bf16 %v733_v30, %v733_v30 }
 0x403   : > { %1417 = vmatmul.mubr.msk.bf16.vlgmr.msra.gmra.mrb[8].mxu0 %vm722_vm6, %v734_v32 }
 0x404   : > { %1427 = vmatpush3.bf16.msra.mxu0 %v857_v33  ;;  %1428 = vmatprep.mubr.msk.bf16.mxu0 %vm1962_vm0, %v1961_v0 }
 0x405   : > { %1438 = vmatprep.subr.bf16.mxu0 %v1961_v0 }
 0x468   : > { %v844_v34 = vpop.xlane.xlu0 %843 }
 0x469   : > { %1613 = vrcp.f32 %v844_v34 }
 0x470   : > { %v964_v35 = vpop.xlane.xlu1 %963 }
 0x471   : > { %1615 = vrcp.f32 %v964_v35 }
 0x473   : > { %v1614_v36 = vpop.eup %1613 }
 0x474   : > { %v846_v37 = vmul.f32 %v1614_v36, %v1606_v19  ;;  %v1079_v44 = vpop.permute.xlu1 %1078 }
 0x475   : > { %v1084_v46 = vsel %vm738_vm5, %v1079_v44, 0 }
 0x476   : > { %v847_v38 = vpack.c.bf16 %v846_v37, %v846_v37 }
 0x478   : > { %1429 = vmatmul.mubr.msk.bf16.vlgmr.msra.gmra.mrb[12].mxu0 %vm722_vm6, %v847_v38  ;;  %v1074_v39 = vpop.xlane.xlu0 %1073 }
 0x479   : > { %1617 = vrcp.f32 %v1074_v39  ;;  %1440 = vmatprep.mubr.msk.bf16.mxu0 %vm1962_vm0, %v1961_v0 }
 0x47b   : > { %v1616_v40 = vpop.eup %1615 }
 0x47c   : > { %v966_v41 = vmul.f32 %v1616_v40, %v1608_v24  ;;  %v969_v42 = vpop.permute.xlu0 %968 }
 0x47d   : > { %v974_v43 = vsel %vm738_vm5, %v969_v42, 0 }
 0x47e   : > { %1439 = vmatpush3.bf16.msra.mxu0 %v974_v43  ;;  %v967_v45 = vpack.c.bf16 %v966_v41, %v966_v41 }
 0x47f   : > { %1450 = vmatprep.subr.bf16.mxu0 %v1961_v0 }
 0x481   : > { %1441 = vmatmul.mubr.msk.bf16.vlgmr.msra.gmra.mrb[16].mxu0 %vm722_vm6, %v967_v45 }
 0x482   : > { %1451 = vmatpush3.bf16.msra.mxu0 %v1084_v46  ;;  %1452 = vmatprep.mubr.msk.bf16.mxu0 %vm1962_vm0, %v1961_v0 }
 0x483   : > { %v1618_v47 = vpop.eup %1617 }
 0x484   : > { %v1076_v48 = vmul.f32 %v1618_v47, %v1610_v26 }
 0x486   : > { %v1077_v49 = vpack.c.bf16 %v1076_v48, %v1076_v48 }
 0x489   : > { %1453 = vmatmul.mubr.msk.bf16.vlgmr.msra.gmra.mrb[20].mxu0 %vm722_vm6, %v1077_v49 }
 0x4d6   : > { %v776_v50 = vpop.f32.mrb[8].mxu0 }
 0x4d7   : > { %v1418_v51 = vpop.f32.mrb[9].mxu0 }
 0x4d8   : > { %v779_v52 = vpop.f32.mrb[10].mxu0 }
 0x4d9   : > { %v1419_v53 = vpop.f32.mrb[11].mxu0 }
 0x54b   : > { %v893_v54 = vpop.f32.mrb[12].mxu0 }
 0x54c   : > { %900 = vrot.lane.b32.xlu0 %v893_v54, %s1968_s19  ;;  %v1430_v55 = vpop.f32.mrb[13].mxu0 }
 0x54d   : > { %v896_v56 = vpop.f32.mrb[14].mxu0 }
 0x54e   : > { %v1431_v57 = vpop.f32.mrb[15].mxu0 }
 0x554   : > { %v1010_v58 = vpop.f32.mrb[16].mxu0 }
 0x555   : > { %v1442_v59 = vpop.f32.mrb[17].mxu0 }
 0x556   : > { %v1013_v60 = vpop.f32.mrb[18].mxu0 }
 0x557   : > { %v1443_v0 = vpop.f32.mrb[19].mxu0 }
 0x55c   : > { %v1120_v61 = vpop.f32.mrb[20].mxu0 }
 0x55d   : > { %1127 = vrot.lane.b32.xlu1 %v1120_v61, %s1968_s19  ;;  %v1454_v62 = vpop.f32.mrb[21].mxu0 }
 0x55e   : > { %v1123_v63 = vpop.f32.mrb[22].mxu0 }
 0x55f   : > { %v1455_v1 = vpop.f32.mrb[23].mxu0 }
 0x5be   : > { %v901_v2 = vpop.permute.xlu0 %900 }
 0x5bf   : > { %v903_v3 = vsel %vm722_vm6, %v776_v50, %v901_v2 }
 0x5c0   : > { %905 = vst.msk [vmem:[%s449_s23] sm:$0xff] %vm904_vm7, %v903_v3 }
 0x5cf   : > { %v1128_v4 = vpop.permute.xlu1 %1127 }
 0x5d0   : > { %v1130_v5 = vsel %vm722_vm6, %v1010_v58, %v1128_v4 }
 0x5d1   : > { %1132 = vrot.lane.b32.xlu1 %v1130_v5, %s1969_s24 }
 0x643   : > { %v1133_v6 = vpop.permute.xlu1 %1132 }
 0x644   : > { %1136 = vst.msk [vmem:[%s449_s23] sm:$0xff] %vm1135_vm8, %v1133_v6 }
 0x645   : > { %1860 = shalt.err (!%p1857_p1)
}
 0x646   : > { %s1861_s3 = scalar_lea.hbm %s2425_s15, 128  ;;  %s1865_s17 = scalar_lea.hbm %s2520_s12, 256 }
 0x647   : > { %p1862_p5 = scmp.ne.s32.totalorder %s2425_s15, %s1861_s3  ;;  %p1866_p11 = scmp.lt.u32.totalorder %s2425_s15, %s2520_s12 }
 0x648   : > { %p1867_p6 = scmp.lt.u32.totalorder %s1865_s17, %s1861_s3  ;;  %p1869_p4 = scmp.lt.u32.totalorder %s1861_s3, %s2425_s15 }
 0x649   : > { %p1863_p8 = pnand %p1862_p5, %p2521_p9 }
 0x64a   : > { %p1868_p13 = por %p1867_p6, %p1866_p11 }
 0x64b   : > { %p1864_p3 = pneg %p1863_p8 }
 0x64c   : > { %p1870_p0 = por %p1869_p4, %p1868_p13 }
 0x64e   : > { %p1871_p7 = pnand %p1870_p0, %p1864_p3 }
 0x650   : > { %1874 = shalt.err (!%p1871_p7)
}
 0x651   : > { %1484 = dma.vmem_to_hbm [thread:$0]  (%p2521_p9), %s2427_s30, 128, %s2425_s15, %s1138_s2  }
 0x652 PF: > { %s1164_s26 = sand.u32 1, %s1929_s27   ;;  %p2522_p12 = scmp.ne.s32.totalorder %s2505_s21, 0 }
 0x653   : > { %p2523_p2 = scmp.ge.s32.totalorder %s1949_s10, 2  ;;  %s1165_s25 = scalar_lea.sflag [#allocation6], %s1164_s26 }
 0x655   : > { %p1513_p10 = pnand %p2523_p2, %p2522_p12 }
 0x657   : > { %1924 = dma.done.wait (!%p1513_p10), %s1165_s25, 128  }
 0x658   : > { %1926 = vsyncadd (!%p1513_p10), %s1165_s25, 4294967168  ;;  %s30_s10 = sadd.s32 1, %s1949_s10   ;;  %s2524_s27 = smov %s1933_s28 }
 0x659   : > { %p27_p1 = scmp.ge.s32.totalorder %s30_s10, 4   ;;  %s2525_s28 = smov %s1937_s29 }
 0x65a   : > { %s2526_s29 = smov %s2234_s14  ;;  %s2527_s30 = smov %s1945_s9 }
 0x65b   : > { %s2528_s9 = smov %s2530_s18  ;;  %29 = sbr.rel (!%p27_p1) target bundleno = 16 (0x10), region = 139 }
 0x662   :  { %1170 = vsyncpa [#allocation5], 1 }
 0x663   :  { %1172 = vsyncpa [#allocation5 + $0x1], 1 }
 0x664   :  { %1173 = vsyncpa [#allocation8], 1 }
 0x665   :  { %1175 = vsyncpa [#allocation8 + $0x1], 1 }
 0x666   :  { %1176 = vsyncpa [#allocation11], 1 }
 0x667   :  { %1177 = vsyncpa [#allocation14], 1 }
 0x668   :  { %1178 = vsyncpa [#allocation17], 1 }
 0x669   :  { %1179 = vsyncpa [#allocation6], 1 }
 0x66a   :  { %1181 = vsyncpa [#allocation6 + $0x1], 1 }

</bundles_post_ra>
